<compile_context>
chip_gen: v7x
topology: tpu7x:2x2x1
jax: 0.10.0
libtpu: 0.0.40
codegen_flags: <defaults>
</compile_context>

<pallas_src>
import functools

import jax
import jax.numpy as jnp
from jax.experimental import pallas as pl
from jax.experimental.pallas import tpu as pltpu

KH, KW = 3, 3                      # conv kernel size (padding = 'same')


def _spatial_attention_kernel(wb_ref, x_ref, o_ref, *, width, chunk):
    # wb_ref : SMEM f32[2*KH*KW + 1]   flattened OIHW conv weight, then bias
    # x_ref  : VMEM (bt, C, H*W)       input dtype
    # o_ref  : VMEM (bt, C, H*W)       input dtype
    bt, c, hw = x_ref.shape
    pad = width + 1                        # covers the largest tap offset (W+1)

    # ---- Channel reduction, chunked: f32 sum accumulator, max in input dtype.
    s = jnp.zeros((bt, hw), jnp.float32)
    m = None
    c0 = 0
    while c0 < c:                          # static (trace-time) chunk loop
        cs = min(chunk, c - c0)
        xc = x_ref[:, c0:c0 + cs, :]       # (bt, cs, HW) input dtype
        s = s + jnp.sum(xc.astype(jnp.float32), axis=1)
        cm = jnp.max(xc, axis=1)
        m = cm if m is None else jnp.maximum(m, cm)
        c0 += cs
    mean = s * (1.0 / c)                   # (bt, HW) f32
    mx = m.astype(jnp.float32)             # (bt, HW) f32 (exact for bf16)

    # ---- Row-boundary masks built in-kernel (no extra HBM input).
    col = jax.lax.broadcasted_iota(jnp.int32, (1, hw), 1) % width
    wm_left = (col > 0).astype(jnp.float32)        # valid where w - 1 >= 0
    wm_right = (col < width - 1).astype(jnp.float32)  # valid where w + 1 < W

    # ---- 3x3 conv over the 2 reduced planes on the flattened layout:
    # vertical out-of-range taps hit the 1-D zero pad, horizontal
    # out-of-range taps are zeroed by the column masks.  Done ONCE per block.
    wgts = [wb_ref[i] for i in range(2 * KH * KW)]
    bias = wb_ref[2 * KH * KW]
    zpad = jnp.zeros((bt, pad), jnp.float32)

    acc = jnp.full((bt, hw), bias, jnp.float32)
    for ci, plane in enumerate((mean, mx)):
        padded = jnp.concatenate([zpad, plane, zpad], axis=1)  # (bt, HW+2*pad)
        for dx in (-1, 0, 1):
            part = None
            for dy in (-1, 0, 1):
                wgt = wgts[ci * KH * KW + (dy + 1) * KW + (dx + 1)]
                off = pad + dy * width + dx
                win = jax.lax.slice(padded, (0, off), (bt, off + hw))
                term = wgt * win
                part = term if part is None else part + term
            if dx == -1:
                part = part * wm_left
            elif dx == 1:
                part = part * wm_right
            acc = acc + part

    attn = jax.nn.sigmoid(acc).astype(o_ref.dtype)             # (bt, HW)

    # ---- Single broadcast multiply + lane-dense store in the input dtype.
    o_ref[...] = x_ref[...] * attn[:, None, :]


def spatial_attention_block(x, weight, bias):
    """x: (N, C, H, W); weight: (1, 2, KH, KW); bias: (1,)."""
    n, c, h, w = x.shape
    hw = h * w
    itemsize = jnp.dtype(x.dtype).itemsize

    # Conv weights + bias -> flat f32 vector, prefetched into SMEM.
    wb = jnp.concatenate(
        [weight.reshape(-1), bias.reshape(-1)]
    ).astype(jnp.float32)                                      # (2*KH*KW + 1,)

    # Lane-dense streaming layout (contiguous reshape: free in the wrapper).
    x2 = x.reshape(n, c, hw)

    # Generation-aware VMEM budget (v7x: 64 MiB/TC, v5e/v6e: 128 MiB).
    try:
        info = pltpu.get_tpu_info()
        vmem_cap = int(getattr(info, "vmem_capacity_bytes", 64 << 20))
    except Exception:
        vmem_cap = 64 << 20
    if vmem_cap >= (100 << 20):            # v5e / v6e
        target_block, vmem_clamp = 16 << 20, 100 << 20
    else:                                  # v7x
        target_block, vmem_clamp = 8 << 20, 48 << 20

    # Channel chunk for the in-kernel reduction (bounds f32 temporaries,
    # keeps the static unroll to <= ~8 chunks).
    chunk = min(c, max(8, -(-c // 8)))

    # Batch tile: as many images as fit the block budget, but keep >= 4 grid
    # steps (>= 2 per v7x TensorCore) so the pipeline overlaps on both cores.
    bytes_per_image = c * hw * itemsize
    bt = max(1, min(target_block // max(bytes_per_image, 1), n))
    if n >= 4:
        bt = max(1, min(bt, n // 4))
    else:
        bt = 1

    def vmem_need(bt_):
        block = bt_ * c * hw * itemsize            # one in + one out block
        red_tmp = bt_ * chunk * hw * 4             # f32 chunk temporaries
        attn_tmp = 10 * bt_ * (hw + 2 * (w + 1)) * 4   # conv-path f32 planes
        return 4 * block + red_tmp + attn_tmp + (4 << 20)

    while bt > 1 and vmem_need(bt) > vmem_clamp:
        bt //= 2
    vmem_limit = int(min(max(vmem_need(bt), 32 << 20), vmem_clamp))

    kernel = functools.partial(_spatial_attention_kernel, width=w, chunk=chunk)
    grid_spec = pltpu.PrefetchScalarGridSpec(
        num_scalar_prefetch=1,
        grid=(pl.cdiv(n, bt),),
        in_specs=[pl.BlockSpec((bt, c, hw), lambda i, wb_ref: (i, 0, 0))],
        out_specs=pl.BlockSpec((bt, c, hw), lambda i, wb_ref: (i, 0, 0)),
    )
    out = pl.pallas_call(
        kernel,
        out_shape=jax.ShapeDtypeStruct((n, c, hw), x.dtype),
        grid_spec=grid_spec,
        compiler_params=pltpu.CompilerParams(
            dimension_semantics=("parallel",),
            vmem_limit_bytes=vmem_limit,
        ),
    )(wb, x2)
    return out.reshape(n, c, h, w)


def reference_forward(x, weight, bias):
    """Pure-JAX reference mirroring the PyTorch forward."""
    avg = jnp.mean(x, axis=1, keepdims=True)
    mx = jnp.max(x, axis=1, keepdims=True)
    cat = jnp.concatenate([avg, mx], axis=1)                   # (N, 2, H, W)
    conv = jax.lax.conv_general_dilated(
        cat, weight, window_strides=(1, 1), padding="SAME",
        dimension_numbers=("NCHW", "OIHW", "NCHW"),
    ) + bias.reshape(1, -1, 1, 1)
    return x * jax.nn.sigmoid(conv)


if __name__ == "__main__":
    key = jax.random.PRNGKey(0)
    kx, kwt, kb = jax.random.split(key, 3)

    N, C, H, W = 4, 4, 16, 16
    x = jax.random.normal(kx, (N, C, H, W), dtype=jnp.float32)

    # Deterministic conv params (PyTorch-like uniform(-1/sqrt(fan_in), +)).
    fan_in = 2 * KH * KW
    bound = 1.0 / (fan_in ** 0.5)
    weight = jax.random.uniform(kwt, (1, 2, KH, KW), jnp.float32, -bound, bound)
    bias = jax.random.uniform(kb, (1,), jnp.float32, -bound, bound)

    out = jax.block_until_ready(spatial_attention_block(x, weight, bias))
    ref = reference_forward(x, weight, bias)
    assert out.shape == (N, C, H, W)
    max_err = float(jnp.max(jnp.abs(out - ref)))
    assert jnp.allclose(out, ref, atol=1e-5, rtol=1e-5), max_err
    print("KERNEL_OK")
</pallas_src>

<mosaic_0001>
module attributes {stable_mosaic.version = 11 : i64} {
  func.func @_spatial_attention_kernel(%arg0: i32, %arg1: memref<19xf32, #tpu.memory_space<smem>>, %arg2: memref<1x4x256xf32, #tpu.memory_space<vmem>>, %arg3: memref<1x4x256xf32, #tpu.memory_space<vmem>>) attributes {dimension_semantics = [#tpu.dimension_semantics<parallel>], iteration_bounds = array<i64: 4>, scalar_prefetch = 1 : i64, scratch_operands = 0 : i64, tpu.core_type = #tpu.core_type<tc>, window_params = [{transform_indices = @transform_0, window_bounds = array<i64: 1, 4, 256>}, {transform_indices = @transform_1, window_bounds = array<i64: 1, 4, 256>}]} {
    %cst = arith.constant 0.000000e+00 : f32
    %0 = vector.broadcast %cst : f32 to vector<1x256xf32>
    %c0 = arith.constant 0 : index
    %c0_0 = arith.constant 0 : index
    %c0_1 = arith.constant 0 : index
    %1 = vector.load %arg2[%c0, %c0_0, %c0_1] : memref<1x4x256xf32, #tpu.memory_space<vmem>>, vector<1x4x256xf32>
    %cst_2 = arith.constant dense<0.000000e+00> : vector<1x256xf32>
    %2 = vector.multi_reduction <add>, %1, %cst_2 [1] : vector<1x4x256xf32> to vector<1x256xf32>
    %3 = arith.addf %0, %2 : vector<1x256xf32>
    %cst_3 = arith.constant dense<0xFF800000> : vector<1x256xf32>
    %4 = vector.multi_reduction <maximumf>, %1, %cst_3 [1] : vector<1x4x256xf32> to vector<1x256xf32>
    %cst_4 = arith.constant 2.500000e-01 : f32
    %5 = vector.broadcast %cst_4 : f32 to vector<1x256xf32>
    %6 = arith.mulf %3, %5 : vector<1x256xf32>
    %7 = tpu.iota {dimensions = array<i32: 1>} : vector<1x256xi32>
    %c16_i32 = arith.constant 16 : i32
    %c0_i32 = arith.constant 0 : i32
    %8 = arith.cmpi eq, %c16_i32, %c0_i32 : i32
    %c1_i32 = arith.constant 1 : i32
    %9 = arith.select %8, %c1_i32, %c16_i32 : i32
    %10 = vector.broadcast %9 : i32 to vector<1x256xi32>
    %11 = arith.remsi %7, %10 : vector<1x256xi32>
    %c0_i32_5 = arith.constant 0 : i32
    %12 = vector.broadcast %c0_i32_5 : i32 to vector<1x256xi32>
    %13 = arith.cmpi ne, %11, %12 : vector<1x256xi32>
    %c0_i32_6 = arith.constant 0 : i32
    %14 = vector.broadcast %c0_i32_6 : i32 to vector<1x256xi32>
    %15 = arith.cmpi slt, %11, %14 : vector<1x256xi32>
    %c0_i32_7 = arith.constant 0 : i32
    %16 = arith.cmpi slt, %9, %c0_i32_7 : i32
    %17 = vector.broadcast %16 : i1 to vector<1x256xi1>
    %18 = vector.broadcast %17 : vector<1x256xi1> to vector<1x256xi1>
    %19 = arith.xori %15, %18 : vector<1x256xi1>
    %20 = arith.andi %19, %13 : vector<1x256xi1>
    %21 = vector.broadcast %9 : i32 to vector<1x256xi32>
    %22 = arith.addi %11, %21 : vector<1x256xi32>
    %23 = arith.select %20, %22, %11 : vector<1x256xi1>, vector<1x256xi32>
    %c0_i32_8 = arith.constant 0 : i32
    %24 = vector.broadcast %c0_i32_8 : i32 to vector<1x256xi32>
    %25 = arith.cmpi sgt, %23, %24 : vector<1x256xi32>
    %26 = arith.extui %25 : vector<1x256xi1> to vector<1x256xi32>
    %27 = arith.sitofp %26 : vector<1x256xi32> to vector<1x256xf32>
    %c15_i32 = arith.constant 15 : i32
    %28 = vector.broadcast %c15_i32 : i32 to vector<1x256xi32>
    %29 = arith.cmpi slt, %23, %28 : vector<1x256xi32>
    %30 = arith.extui %29 : vector<1x256xi1> to vector<1x256xi32>
    %31 = arith.sitofp %30 : vector<1x256xi32> to vector<1x256xf32>
    %c0_9 = arith.constant 0 : index
    %32 = memref.load %arg1[%c0_9] : memref<19xf32, #tpu.memory_space<smem>>
    %c1 = arith.constant 1 : index
    %33 = memref.load %arg1[%c1] : memref<19xf32, #tpu.memory_space<smem>>
    %c2 = arith.constant 2 : index
    %34 = memref.load %arg1[%c2] : memref<19xf32, #tpu.memory_space<smem>>
    %c3 = arith.constant 3 : index
    %35 = memref.load %arg1[%c3] : memref<19xf32, #tpu.memory_space<smem>>
    %c4 = arith.constant 4 : index
    %36 = memref.load %arg1[%c4] : memref<19xf32, #tpu.memory_space<smem>>
    %c5 = arith.constant 5 : index
    %37 = memref.load %arg1[%c5] : memref<19xf32, #tpu.memory_space<smem>>
    %c6 = arith.constant 6 : index
    %38 = memref.load %arg1[%c6] : memref<19xf32, #tpu.memory_space<smem>>
    %c7 = arith.constant 7 : index
    %39 = memref.load %arg1[%c7] : memref<19xf32, #tpu.memory_space<smem>>
    %c8 = arith.constant 8 : index
    %40 = memref.load %arg1[%c8] : memref<19xf32, #tpu.memory_space<smem>>
    %c9 = arith.constant 9 : index
    %41 = memref.load %arg1[%c9] : memref<19xf32, #tpu.memory_space<smem>>
    %c10 = arith.constant 10 : index
    %42 = memref.load %arg1[%c10] : memref<19xf32, #tpu.memory_space<smem>>
    %c11 = arith.constant 11 : index
    %43 = memref.load %arg1[%c11] : memref<19xf32, #tpu.memory_space<smem>>
    %c12 = arith.constant 12 : index
    %44 = memref.load %arg1[%c12] : memref<19xf32, #tpu.memory_space<smem>>
    %c13 = arith.constant 13 : index
    %45 = memref.load %arg1[%c13] : memref<19xf32, #tpu.memory_space<smem>>
    %c14 = arith.constant 14 : index
    %46 = memref.load %arg1[%c14] : memref<19xf32, #tpu.memory_space<smem>>
    %c15 = arith.constant 15 : index
    %47 = memref.load %arg1[%c15] : memref<19xf32, #tpu.memory_space<smem>>
    %c16 = arith.constant 16 : index
    %48 = memref.load %arg1[%c16] : memref<19xf32, #tpu.memory_space<smem>>
    %c17 = arith.constant 17 : index
    %49 = memref.load %arg1[%c17] : memref<19xf32, #tpu.memory_space<smem>>
    %c18 = arith.constant 18 : index
    %50 = memref.load %arg1[%c18] : memref<19xf32, #tpu.memory_space<smem>>
    %cst_10 = arith.constant 0.000000e+00 : f32
    %51 = vector.broadcast %cst_10 : f32 to vector<1x17xf32>
    %52 = vector.broadcast %50 : f32 to vector<1x256xf32>
    %53 = tpu.concatenate %51, %6, %51 in 1 : vector<1x17xf32>, vector<1x256xf32>, vector<1x17xf32> -> vector<1x290xf32>
    %54 = vector.extract_strided_slice %53 {offsets = [0, 0], sizes = [1, 256], strides = [1, 1]} : vector<1x290xf32> to vector<1x256xf32>
    %55 = vector.broadcast %32 : f32 to vector<1x256xf32>
    %56 = arith.mulf %55, %54 : vector<1x256xf32>
    %57 = vector.extract_strided_slice %53 {offsets = [0, 16], sizes = [1, 256], strides = [1, 1]} : vector<1x290xf32> to vector<1x256xf32>
    %58 = vector.broadcast %35 : f32 to vector<1x256xf32>
    %59 = arith.mulf %58, %57 : vector<1x256xf32>
    %60 = arith.addf %56, %59 : vector<1x256xf32>
    %61 = vector.extract_strided_slice %53 {offsets = [0, 32], sizes = [1, 256], strides = [1, 1]} : vector<1x290xf32> to vector<1x256xf32>
    %62 = vector.broadcast %38 : f32 to vector<1x256xf32>
    %63 = arith.mulf %62, %61 : vector<1x256xf32>
    %64 = arith.addf %60, %63 : vector<1x256xf32>
    %65 = arith.mulf %64, %27 : vector<1x256xf32>
    %66 = arith.addf %52, %65 : vector<1x256xf32>
    %67 = vector.extract_strided_slice %53 {offsets = [0, 1], sizes = [1, 256], strides = [1, 1]} : vector<1x290xf32> to vector<1x256xf32>
    %68 = vector.broadcast %33 : f32 to vector<1x256xf32>
    %69 = arith.mulf %68, %67 : vector<1x256xf32>
    %70 = vector.extract_strided_slice %53 {offsets = [0, 17], sizes = [1, 256], strides = [1, 1]} : vector<1x290xf32> to vector<1x256xf32>
    %71 = vector.broadcast %36 : f32 to vector<1x256xf32>
    %72 = arith.mulf %71, %70 : vector<1x256xf32>
    %73 = arith.addf %69, %72 : vector<1x256xf32>
    %74 = vector.extract_strided_slice %53 {offsets = [0, 33], sizes = [1, 256], strides = [1, 1]} : vector<1x290xf32> to vector<1x256xf32>
    %75 = vector.broadcast %39 : f32 to vector<1x256xf32>
    %76 = arith.mulf %75, %74 : vector<1x256xf32>
    %77 = arith.addf %73, %76 : vector<1x256xf32>
    %78 = arith.addf %66, %77 : vector<1x256xf32>
    %79 = vector.extract_strided_slice %53 {offsets = [0, 2], sizes = [1, 256], strides = [1, 1]} : vector<1x290xf32> to vector<1x256xf32>
    %80 = vector.broadcast %34 : f32 to vector<1x256xf32>
    %81 = arith.mulf %80, %79 : vector<1x256xf32>
    %82 = vector.extract_strided_slice %53 {offsets = [0, 18], sizes = [1, 256], strides = [1, 1]} : vector<1x290xf32> to vector<1x256xf32>
    %83 = vector.broadcast %37 : f32 to vector<1x256xf32>
    %84 = arith.mulf %83, %82 : vector<1x256xf32>
    %85 = arith.addf %81, %84 : vector<1x256xf32>
    %86 = vector.extract_strided_slice %53 {offsets = [0, 34], sizes = [1, 256], strides = [1, 1]} : vector<1x290xf32> to vector<1x256xf32>
    %87 = vector.broadcast %40 : f32 to vector<1x256xf32>
    %88 = arith.mulf %87, %86 : vector<1x256xf32>
    %89 = arith.addf %85, %88 : vector<1x256xf32>
    %90 = arith.mulf %89, %31 : vector<1x256xf32>
    %91 = arith.addf %78, %90 : vector<1x256xf32>
    %92 = tpu.concatenate %51, %4, %51 in 1 : vector<1x17xf32>, vector<1x256xf32>, vector<1x17xf32> -> vector<1x290xf32>
    %93 = vector.extract_strided_slice %92 {offsets = [0, 0], sizes = [1, 256], strides = [1, 1]} : vector<1x290xf32> to vector<1x256xf32>
    %94 = vector.broadcast %41 : f32 to vector<1x256xf32>
    %95 = arith.mulf %94, %93 : vector<1x256xf32>
    %96 = vector.extract_strided_slice %92 {offsets = [0, 16], sizes = [1, 256], strides = [1, 1]} : vector<1x290xf32> to vector<1x256xf32>
    %97 = vector.broadcast %44 : f32 to vector<1x256xf32>
    %98 = arith.mulf %97, %96 : vector<1x256xf32>
    %99 = arith.addf %95, %98 : vector<1x256xf32>
    %100 = vector.extract_strided_slice %92 {offsets = [0, 32], sizes = [1, 256], strides = [1, 1]} : vector<1x290xf32> to vector<1x256xf32>
    %101 = vector.broadcast %47 : f32 to vector<1x256xf32>
    %102 = arith.mulf %101, %100 : vector<1x256xf32>
    %103 = arith.addf %99, %102 : vector<1x256xf32>
    %104 = arith.mulf %103, %27 : vector<1x256xf32>
    %105 = arith.addf %91, %104 : vector<1x256xf32>
    %106 = vector.extract_strided_slice %92 {offsets = [0, 1], sizes = [1, 256], strides = [1, 1]} : vector<1x290xf32> to vector<1x256xf32>
    %107 = vector.broadcast %42 : f32 to vector<1x256xf32>
    %108 = arith.mulf %107, %106 : vector<1x256xf32>
    %109 = vector.extract_strided_slice %92 {offsets = [0, 17], sizes = [1, 256], strides = [1, 1]} : vector<1x290xf32> to vector<1x256xf32>
    %110 = vector.broadcast %45 : f32 to vector<1x256xf32>
    %111 = arith.mulf %110, %109 : vector<1x256xf32>
    %112 = arith.addf %108, %111 : vector<1x256xf32>
    %113 = vector.extract_strided_slice %92 {offsets = [0, 33], sizes = [1, 256], strides = [1, 1]} : vector<1x290xf32> to vector<1x256xf32>
    %114 = vector.broadcast %48 : f32 to vector<1x256xf32>
    %115 = arith.mulf %114, %113 : vector<1x256xf32>
    %116 = arith.addf %112, %115 : vector<1x256xf32>
    %117 = arith.addf %105, %116 : vector<1x256xf32>
    %118 = vector.extract_strided_slice %92 {offsets = [0, 2], sizes = [1, 256], strides = [1, 1]} : vector<1x290xf32> to vector<1x256xf32>
    %119 = vector.broadcast %43 : f32 to vector<1x256xf32>
    %120 = arith.mulf %119, %118 : vector<1x256xf32>
    %121 = vector.extract_strided_slice %92 {offsets = [0, 18], sizes = [1, 256], strides = [1, 1]} : vector<1x290xf32> to vector<1x256xf32>
    %122 = vector.broadcast %46 : f32 to vector<1x256xf32>
    %123 = arith.mulf %122, %121 : vector<1x256xf32>
    %124 = arith.addf %120, %123 : vector<1x256xf32>
    %125 = vector.extract_strided_slice %92 {offsets = [0, 34], sizes = [1, 256], strides = [1, 1]} : vector<1x290xf32> to vector<1x256xf32>
    %126 = vector.broadcast %49 : f32 to vector<1x256xf32>
    %127 = arith.mulf %126, %125 : vector<1x256xf32>
    %128 = arith.addf %124, %127 : vector<1x256xf32>
    %129 = arith.mulf %128, %31 : vector<1x256xf32>
    %130 = arith.addf %117, %129 : vector<1x256xf32>
    %131 = arith.negf %130 : vector<1x256xf32>
    %132 = math.exp %131 : vector<1x256xf32>
    %cst_11 = arith.constant 1.000000e+00 : f32
    %133 = vector.broadcast %cst_11 : f32 to vector<1x256xf32>
    %134 = arith.addf %133, %132 : vector<1x256xf32>
    %135 = arith.divf %133, %134 : vector<1x256xf32>
    %c0_12 = arith.constant 0 : index
    %c0_13 = arith.constant 0 : index
    %c0_14 = arith.constant 0 : index
    %136 = vector.load %arg2[%c0_12, %c0_13, %c0_14] : memref<1x4x256xf32, #tpu.memory_space<vmem>>, vector<1x4x256xf32>
    %137 = vector.shape_cast %135 : vector<1x256xf32> to vector<1x1x256xf32>
    %138 = vector.broadcast %137 : vector<1x1x256xf32> to vector<1x4x256xf32>
    %139 = arith.mulf %136, %138 : vector<1x4x256xf32>
    %c0_15 = arith.constant 0 : index
    %c0_16 = arith.constant 0 : index
    %c0_17 = arith.constant 0 : index
    %140 = vector.load %arg3[%c0_15, %c0_16, %c0_17] : memref<1x4x256xf32, #tpu.memory_space<vmem>>, vector<1x4x256xf32>
    tpu.vector_store %arg3[%c0_15, %c0_16, %c0_17], %139 {strides = array<i32>} : memref<1x4x256xf32, #tpu.memory_space<vmem>>, vector<1x4x256xf32>,
    return
  }
  func.func @transform_0(%arg0: i32, %arg1: memref<19xf32, #tpu.memory_space<smem>>) -> (i32, i32, i32) {
    %c0_i32 = arith.constant 0 : i32
    %c0_i32_0 = arith.constant 0 : i32
    %c0_i32_1 = arith.constant 0 : i32
    return %arg0, %c0_i32, %c0_i32_0 : i32, i32, i32
  }
  func.func @transform_1(%arg0: i32, %arg1: memref<19xf32, #tpu.memory_space<smem>>) -> (i32, i32, i32) {
    %c0_i32 = arith.constant 0 : i32
    %c0_i32_0 = arith.constant 0 : i32
    %c0_i32_1 = arith.constant 0 : i32
    return %arg0, %c0_i32, %c0_i32_0 : i32, i32, i32
  }
}

</mosaic_0001>

<bundles_post_ra>
// kernel: tpu_custom_call.1
= control target key start
LH: loop header
LB: loop body
LE: loop exit
PB: predicated region body
PF: predicated region fallthrough
CT: control target
= control target key end

     0   :  { %s1360_s0 = inlined_call_operand.hbm [shape: f32[19], index: 0, kind: input, shape index: {}]   ;;  %s1361_s1 = inlined_call_operand.hbm [shape: f32[4,4,256], index: 1, kind: input, shape index: {}]   ;;  %s1362_s2 = inlined_call_operand.hbm [shape: f32[4,4,256], index: 2, kind: output, shape index: {}]  }
   0x1   :  { %s833_s11 = scalar_lea.hbm %s1360_s0, 16 }
   0x2   :  { %p834_p0 = scmp.ne.s32.totalorder %s1360_s0, %s833_s11  ;;  %p837_p1 = scmp.lt.u32.totalorder %s833_s11, %s1360_s0 }
   0x4   :  { %p839_p2 = pnand %p837_p1, %p834_p0 }
   0x6   :  { %842 = shalt.err (!%p839_p2)  }
   0x7   :  { %s943_s16 = smov [#allocation3]  }
   0x8   :  { %8 = dma.hbm_to_smem %s1360_s0, 16, %s943_s16, [#allocation2] }
   0x9   :  { %917 = dma.done.wait [#allocation2], 16 }
   0xa   :  { %918 = vsyncadd [#allocation2], 4294967280 }
   0xb   :  { %10 = sfence }
   0xc   :  { %11 = vsyncpa [#allocation5], 0 }
   0xd   :  { %13 = vsyncpa [#allocation5 + $0x1], 0 }
   0xe   :  { %14 = vsyncpa [#allocation6], 0 }
   0xf   :  { %16 = vsyncpa [#allocation6 + $0x1], 0  ;;  %s980_s19 = smov 0   ;;  %s982_s20 = smov 0  }
  0x10   :  { %s984_s21 = smov 0   ;;  %s986_s22 = smov 0  }
  0x11 LB: > { %s1001_s0 = sadd.s32 4294967295, %s941_s22   ;;  %s725_s23 = sadd.s32 4294967294, %s941_s22   ;;  %s941_s22 = sphi %s986_s22, %s1376_s22   ;;  %s937_s21 = sphi %s984_s21, %s1375_s21   ;;  %s933_s20 = sphi %s982_s20, %s1374_s20   ;;  %s929_s19 = sphi %s980_s19, %s1373_s19  }
  0x12   : > { %s1005_s24 = sadd.s32 1, %s941_s22   ;;  %s29_s25 = sadd.s32 1, %s937_s21 }
  0x13   : > { %s26_s26 = ssub.s32 %s941_s22, %s1005_s24  ;;  %p36_p3 = scmp.ne.s32.totalorder %s937_s21, %s933_s20 }
  0x14   : > { %p27_p4 = scmp.eq.s32.totalorder %s26_s26, 0  ;;  %p37_p5 = scmp.eq.s32.totalorder %s941_s22, 0 }
  0x15   : > { %p42_p6 = scmp.ne.s32.totalorder %s933_s20, %s929_s19  ;;  %p43_p7 = scmp.eq.s32.totalorder %s1001_s0, 0 }
  0x16   : > { %s1017_s27 = scalar_select %p27_p4, %s937_s21, %s29_s25  }
  0x17   : > { %p1019_p8 = por %p37_p5, %p36_p3  ;;  %p1023_p9 = por %p43_p7, %p42_p6 }
  0x18   : > { %p66_p10 = scmp.eq.s32.totalorder %s1001_s0, 3  ;;  %p72_p11 = scmp.eq.s32.totalorder %s725_s23, 3 }
  0x19   : > { %p777_p12 = scmp.lt.s32.totalorder %s941_s22, 4  ;;  %s92_s4 = sand.u32 1, %s937_s21  }
  0x1a   : > { %p1029_p13 = por %p66_p10, %p36_p3  ;;  %p1033_p0 = por %p72_p11, %p42_p6 }
  0x1b   : > { %s763_s5 = sshll.u32 %s941_s22, 7  ;;  %s728_s6 = sshll.u32 %s92_s4, 3 }
  0x1c   : > { %s1366_s30 = scalar_select %p1029_p13, 1, 0 }
  0x1d   : > { %s1367_s3 = scalar_select %p1033_p0, 1, 0 }
  0x1e   : > { %s1042_s9 = scalar_lea.hbm %s1361_s1, %s763_s5  ;;  %s96_s10 = scalar_lea.vmem [#allocation4], %s728_s6 }
  0x1f   : > { %s104_s11 = sshll.u32 %s96_s10, 4  ;;  %p1046_p1 = pnand %p777_p12, %p1019_p8  ;;  %s1050_s11 = int_to_ptr.vmem [resolvable:$true] %s104_s11 }
  0x20   : > { %s93_s13 = scalar_lea.sflag [#allocation5], %s92_s4  ;;  %s843_s14 = scalar_lea.hbm %s1042_s9, 128 }
  0x21   : > { %p844_p4 = scmp.ne.s32.totalorder %s1042_s9, %s843_s14  ;;  %p845_p5 = pneg %p1046_p1 }
  0x22   : > { %s848_s17 = scalar_lea.hbm %s1361_s1, 512  ;;  %p849_p8 = scmp.lt.u32.totalorder %s1042_s9, %s1361_s1 }
  0x23   : > { %p846_p6 = pnand %p845_p5, %p844_p4  ;;  %p850_p10 = scmp.lt.u32.totalorder %s848_s17, %s843_s14 }
  0x24   : > { %p852_p12 = scmp.lt.u32.totalorder %s843_s14, %s1042_s9 }
  0x25   : > { %p847_p7 = pneg %p846_p6  ;;  %p851_p11 = por %p850_p10, %p849_p8 }
  0x27   : > { %p853_p2 = por %p852_p12, %p851_p11 }
  0x29   : > { %p854_p3 = pnand %p853_p2, %p847_p7 }
  0x2b   : > { %857 = shalt.err (!%p854_p3)
}
  0x2c   : > { %s858_s25 = scalar_lea.vmem %s1050_s11, 128  ;;  %s944_s26 = smov [#allocation4]  }
  0x2d   : > { %p859_p4 = scmp.ne.s32.totalorder %s1050_s11, %s858_s25  ;;  %s863_s28 = sshll.u32 %s944_s26, 4  ;;  %s864_s28 = int_to_ptr.vmem [resolvable:$false] %s863_s28 }
  0x2e   : > { %s865_s4 = scalar_lea.vmem %s864_s28, 256  ;;  %p866_p13 = scmp.lt.s32.totalorder %s1050_s11, %s864_s28 }
  0x2f   : > { %p861_p6 = pnand %p859_p4, %p845_p5  ;;  %p867_p8 = scmp.lt.s32.totalorder %s865_s4, %s858_s25 }
  0x31   : > { %p862_p0 = pneg %p861_p6  ;;  %p868_p10 = por %p867_p8, %p866_p13 }
  0x33   : > { %p869_p11 = pnand %p868_p10, %p862_p0 }
  0x35   : > { %872 = shalt.err (!%p869_p11)
}
  0x36   : > { %772 = dma.hbm_to_vmem [thread:$0]  (!%p1046_p1), %s1042_s9, 128, %s1050_s11, %s93_s13  }
  0x37   : > { %p1369_p2 = scmp.lt.s32.totalorder %s941_s22, 5  ;;  %p1370_p3 = scmp.ge.s32.totalorder %s941_s22, 1 }
  0x39   : > { %p110_p5 = pnand %p1370_p3, %p1369_p2 }
  0x3a   : > { %s1084_s5 = sand.u32 (!%p110_p5), 1, %s933_s20  }
  0x3b   : > { %113 = sbr.rel (%p110_p5) target bundleno = 545 (0x221), region = 24  ;;  %s732_s6 = sshll.u32 (!%p110_p5), %s1084_s5, 3 }
  0x3c   : > { %s116_s7 = scalar_lea.sflag (!%p110_p5), [#allocation5], %s1084_s5  ;;  %s119_s8 = scalar_lea.vmem (!%p110_p5), [#allocation4], %s732_s6 }
  0x42   : > { %920 = dma.done.wait (%p1023_p9), %s116_s7, 128  }
  0x43   : > { %922 = vsyncadd (%p1023_p9), %s116_s7, 4294967168  ;;  %v175_v0 = vlaneseq  ;;  %vm142_vm0 = vcmask 1043456   ;;  %v1094_v1 = vld [vmem:[%s119_s8] sm:$0xff]  ;;  %s945_s29 = smov 17   ;;  %v946_v37 = vmov 0.0   ;;  %s947_s9 = smov 2  }
  0x44   : > { %v159_v2 = vsel %vm142_vm0, %v1094_v1, -inf  ;;  %v143_v3 = vsel %vm142_vm0, %v1094_v1, 0.0  ;;  %v140_v4 = vcombine.high %v1094_v1, %v1094_v1  ;;  %s750_s10 = sld [smem:[#allocation3 + $0xd]]  ;;  %s751_s11 = sld [smem:[#allocation3 + $0xe]]  ;;  %vm240_vm3 = vcmask 138240  }
  0x45   : > { %v1101_v5 = vand.u32 127, %v175_v0  ;;  %v160_v6 = vrot.slane %v159_v2, 4  ;;  %v144_v7 = vrot.slane %v143_v3, 4  ;;  %s741_s12 = sld [smem:[#allocation3 + $0x4]]  ;;  %s753_s13 = sld [smem:[#allocation3 + $0x10]]  ;;  %vm263_vm4 = vcmask 916480  }
  0x46   : > { %v166_v8 = vsel %vm142_vm0, %v140_v4, -inf  ;;  %v150_v9 = vsel %vm142_vm0, %v140_v4, 0.0  ;;  %s742_s14 = sld [smem:[#allocation3 + $0x5]]  ;;  %s744_s15 = sld [smem:[#allocation3 + $0x7]]  ;;  %vm283_vm5 = vcmask 785408   ;;  %vm408_vm6 = vcmask 15360  }
  0x47   : > { %v161_v10 = vmax.f32 %v159_v2, %v160_v6  ;;  %v145_v11 = vadd.f32 %v144_v7, %v143_v3  ;;  %v167_v12 = vrot.slane %v166_v8, 4  ;;  %v151_v13 = vrot.slane %v150_v9, 4  ;;  %s745_s16 = sld [smem:[#allocation3 + $0x8]]  ;;  %s948_s17 = smov 112  }
  0x48   : > { %v1104_v14 = vadd.s32 128, %v1101_v5  ;;  %v182_v23 = vand.u32 15, %v1101_v5  ;;  %s949_s18 = smov 96   ;;  %s754_s23 = sld [smem:[#allocation3 + $0x11]]  ;;  %vm349_vm9 = vcmask 1039360   ;;  %vm425_vm10 = vcmask 1031168  }
  0x49   : > { %v162_v15 = vrot.slane %v161_v10, 2  ;;  %v146_v16 = vrot.slane %v145_v11, 2  ;;  %v168_v17 = vmax.f32 %v166_v8, %v167_v12  ;;  %v152_v18 = vadd.f32 %v151_v13, %v150_v9  ;;  %s743_s25 = sld [smem:[#allocation3 + $0x6]]  ;;  %s740_s26 = sld [smem:[#allocation3 + $0x3]] }
  0x4a   : > { %v189_v24 = vand.u32 15, %v1104_v14  ;;  %vm208_vm1 = vcmp.lt.s32.totalorder %v182_v23, 15  ;;  %v493_v41 = vstv %s750_s10  ;;  %v554_v42 = vstv %s751_s11  ;;  %s749_s28 = sld [smem:[#allocation3 + $0xc]]  ;;  %s752_s4 = sld [smem:[#allocation3 + $0xf]] }
  0x4b   : > { %v163_v19 = vmax.f32 %v161_v10, %v162_v15  ;;  %v147_v20 = vadd.f32 %v146_v16, %v145_v11  ;;  %v169_v21 = vrot.slane %v168_v17, 2  ;;  %v153_v22 = vrot.slane %v152_v18, 2  ;;  %s747_s7 = sld [smem:[#allocation3 + $0xa]]  ;;  %s738_s8 = sld [smem:[#allocation3 + $0x1]] }
  0x4c   : > { %vm209_vm2 = vcmp.lt.s32.totalorder %v189_v24, 15  ;;  %v736_v38 = vsel %vm208_vm1, 1.0, %v946_v37  ;;  %v298_v45 = vstv %s741_s12  ;;  %v514_v50 = vstv %s753_s13  ;;  %s748_s10 = sld [smem:[#allocation3 + $0xb]]  ;;  %s1242_s11 = sld [smem:[#allocation3 + $0x9]] }
  0x4d   : > { %v164_v25 = vrot.slane %v163_v19, 1  ;;  %v148_v26 = vrot.slane %v147_v20, 1  ;;  %v170_v27 = vmax.f32 %v168_v17, %v169_v21  ;;  %v154_v28 = vadd.f32 %v153_v22, %v152_v18  ;;  %s951_s12 = smov 126   ;;  %s1260_s13 = sld [smem:[#allocation3]] }
  0x4e   : > { %v737_v39 = vsel %vm209_vm2, 1.0, %v946_v37  ;;  %v360_v52 = vstv %s742_s14  ;;  %v319_v53 = vstv %s744_s15  ;;  %v381_v59 = vstv %s745_s16  ;;  %s755_s14 = sld [smem:[#allocation3 + $0x12]]  ;;  %s764_s15 = sshll.u32 %s1001_s0, 7 }
  0x4f   : > { %v165_v29 = vmax.f32 %v163_v19, %v164_v25  ;;  %v149_v30 = vadd.f32 %v148_v26, %v147_v20  ;;  %v171_v31 = vrot.slane %v170_v27, 1  ;;  %v155_v32 = vrot.slane %v154_v28, 1  ;;  %s137_s16 = scalar_lea.vmem [#allocation7], %s732_s6  ;;  %p1371_p13 = scmp.ne.s32.totalorder %s1366_s30, 0 }
  0x50   : > { %v819_v40 = vpack.i.bf16 %v737_v39, %v736_v38  ;;  %v575_v18 = vstv %s754_s23  ;;  %v270_v25 = vstv %s743_s25  ;;  %v250_v26 = vstv %s740_s26  ;;  %s1317_s25 = scalar_lea.hbm %s1362_s2, %s764_s15  ;;  %s641_s26 = scalar_lea.sflag [#allocation6], %s1084_s5 }
  0x51   : > { %434 = vrot.lane.b32.xlu1 %v165_v29, %s945_s29  ;;  %v173_v33 = vmul.f32 0.25, %v149_v30  ;;  %v172_v34 = vmax.f32 %v170_v27, %v171_v31  ;;  %v156_v35 = vadd.f32 %v155_v32, %v154_v28  ;;  %v447_v29 = vstv %s749_s28  ;;  %s952_s0 = smov [#allocation7]  }
  0x52   : > { %v466_v32 = vstv %s752_s4  ;;  %vm203_vm7 = vcmp.gt.s32.totalorder %v189_v24, 0  ;;  %vm202_vm8 = vcmp.gt.s32.totalorder %v182_v23, 0  ;;  %s877_s6 = sshll.u32 %s952_s0, 4  ;;  %s878_s6 = int_to_ptr.vmem [resolvable:$false] %s877_s6 }
  0x53   : > { %236 = vrot.lane.b32.xlu0 %v173_v33, %s945_s29  ;;  %v174_v36 = vmul.f32 0.25, %v156_v35  ;;  %s879_s4 = scalar_lea.vmem %s878_s6, 256 }
  0x55   : > { %436 = vrot.lane.b32.xlu1 %v172_v34, %s945_s29 }
  0x57   : > { %238 = vrot.lane.b32.xlu0 %v174_v36, %s945_s29  ;;  %s739_s29 = sld [smem:[#allocation3 + $0x2]] }
  0x5b   : > { %820 = vrot.lane.b32.xlu0 %v819_v40, %s947_s9  ;;  %s950_s9 = smov 127  }
  0xc3   : > { %v435_v43 = vpop.permute.xlu1 %434 }
  0xc4   : > { %v1115_v44 = vsel %vm240_vm3, 0.0, %v435_v43 }
  0xc5   : > { %v237_v46 = vpop.permute.xlu0 %236  ;;  %v494_v47 = vmul.f32 %v493_v41, %v1115_v44  ;;  %v555_v48 = vmul.f32 %v554_v42, %v1115_v44  ;;  %v515_v54 = vmul.f32 %v514_v50, %v1115_v44  ;;  %v576_v19 = vmul.f32 %v575_v18, %v1115_v44 }
  0xc6   : > { %v1120_v49 = vsel %vm240_vm3, 0.0, %v237_v46  ;;  %v448_v31 = vmul.f32 %v447_v29, %v1115_v44  ;;  %v467_v35 = vmul.f32 %v466_v32, %v1115_v44 }
  0xc7   : > { %500 = vrot.lane.b32.xlu1 %v494_v47, %s948_s17  ;;  %561 = vrot.lane.b32.xlu0 %v555_v48, %s948_s17  ;;  %v299_v51 = vmul.f32 %v298_v45, %v1120_v49  ;;  %v437_v55 = vpop.permute.xlu1 %436  ;;  %v361_v56 = vmul.f32 %v360_v52, %v1120_v49  ;;  %v320_v57 = vmul.f32 %v319_v53, %v1120_v49 }
  0xc8   : > { %v1131_v58 = vsel %vm240_vm3, %v435_v43, %v437_v55  ;;  %v1136_v60 = vsel %vm240_vm3, %v437_v55, 0.0  ;;  %v382_v61 = vmul.f32 %v381_v59, %v1120_v49  ;;  %v271_v27 = vmul.f32 %v270_v25, %v1120_v49 }
  0xc9   : > { %v495_v62 = vmul.f32 %v493_v41, %v1131_v58  ;;  %v496_v63 = vmul.f32 %v493_v41, %v1136_v60  ;;  %v557_v2 = vmul.f32 %v554_v42, %v1136_v60  ;;  %v239_v3 = vpop.permute.xlu0 %238  ;;  %v556_v6 = vmul.f32 %v554_v42, %v1131_v58 }
  0xca   : > { %v1147_v4 = vsel %vm240_vm3, %v239_v3, 0.0  ;;  %v516_v7 = vmul.f32 %v514_v50, %v1131_v58  ;;  %v1152_v8 = vsel %vm240_vm3, %v237_v46, %v239_v3  ;;  %v517_v20 = vmul.f32 %v514_v50, %v1136_v60 }
  0xcb   : > { %521 = vrot.lane.b32.xlu1 %v515_v54, %s949_s18  ;;  %305 = vrot.lane.b32.xlu0 %v299_v51, %s948_s17  ;;  %v301_v9 = vmul.f32 %v298_v45, %v1147_v4  ;;  %v300_v10 = vmul.f32 %v298_v45, %v1152_v8  ;;  %v362_v11 = vmul.f32 %v360_v52, %v1152_v8 }
  0xcc   : > { %v363_v12 = vmul.f32 %v360_v52, %v1147_v4  ;;  %v322_v13 = vmul.f32 %v319_v53, %v1147_v4  ;;  %v321_v15 = vmul.f32 %v319_v53, %v1152_v8  ;;  %v383_v16 = vmul.f32 %v381_v59, %v1152_v8 }
  0xcd   : > { %v384_v17 = vmul.f32 %v381_v59, %v1147_v4  ;;  %v578_v21 = vmul.f32 %v575_v18, %v1136_v60  ;;  %v577_v22 = vmul.f32 %v575_v18, %v1131_v58  ;;  %v251_v28 = vmul.f32 %v250_v26, %v1120_v49  ;;  %v821_v42 = vpop.permute.xlu0 %820 }
  0xce   : > { %v449_v30 = vmul.f32 %v447_v29, %v1131_v58  ;;  %v468_v33 = vmul.f32 %v466_v32, %v1131_v58  ;;  %v450_v34 = vmul.f32 %v447_v29, %v1136_v60  ;;  %v252_v36 = vmul.f32 %v250_v26, %v1152_v8 }
  0xcf   : > { %367 = vrot.lane.b32.xlu1 %v361_v56, %s948_s17  ;;  %326 = vrot.lane.b32.xlu0 %v320_v57, %s949_s18  ;;  %v469_v38 = vmul.f32 %v466_v32, %v1136_v60  ;;  %v273_v39 = vmul.f32 %v270_v25, %v1147_v4  ;;  %v253_v40 = vmul.f32 %v250_v26, %v1147_v4  ;;  %v489_v53 = vstv %s747_s7 }
  0xd0   : > { %v272_v41 = vmul.f32 %v270_v25, %v1152_v8  ;;  %v490_v57 = vmul.f32 %v489_v53, %v1115_v44  ;;  %v1229_v25 = vunpack.i.l.bf16 %v821_v42 }
  0xd3   : > { %388 = vrot.lane.b32.xlu1 %v382_v61, %s949_s18  ;;  %502 = vrot.lane.b32.xlu0 %v495_v62, %s948_s17 }
  0xd7   : > { %504 = vrot.lane.b32.xlu1 %v496_v63, %s948_s17  ;;  %565 = vrot.lane.b32.xlu0 %v557_v2, %s948_s17 }
  0xdb   : > { %563 = vrot.lane.b32.xlu1 %v556_v6, %s948_s17  ;;  %523 = vrot.lane.b32.xlu0 %v516_v7, %s949_s18  ;;  %v294_v7 = vstv %s738_s8 }
  0xdf   : > { %309 = vrot.lane.b32.xlu0 %v301_v9, %s948_s17  ;;  %307 = vrot.lane.b32.xlu1 %v300_v10, %s948_s17 }
  0xe3   : > { %369 = vrot.lane.b32.xlu0 %v362_v11, %s948_s17  ;;  %371 = vrot.lane.b32.xlu1 %v363_v12, %s948_s17  ;;  %v296_v12 = vmul.f32 %v294_v7, %v1152_v8 }
  0xe7   : > { %330 = vrot.lane.b32.xlu0 %v322_v13, %s949_s18  ;;  %328 = vrot.lane.b32.xlu1 %v321_v15, %s949_s18  ;;  %v356_v13 = vstv %s739_s29 }
  0xeb   : > { %390 = vrot.lane.b32.xlu0 %v383_v16, %s949_s18  ;;  %392 = vrot.lane.b32.xlu1 %v384_v17, %s949_s18 }
  0xef   : > { %582 = vrot.lane.b32.xlu0 %v576_v19, %s949_s18  ;;  %525 = vrot.lane.b32.xlu1 %v517_v20, %s949_s18  ;;  %v358_v20 = vmul.f32 %v356_v13, %v1152_v8 }
  0xf3   : > { %586 = vrot.lane.b32.xlu0 %v578_v21, %s949_s18  ;;  %584 = vrot.lane.b32.xlu1 %v577_v22, %s949_s18  ;;  %v1227_v22 = vunpack.i.h.bf16 %v821_v42 }
  0xf7   : > { %277 = vrot.lane.b32.xlu0 %v271_v27, %s949_s18  ;;  %257 = vrot.lane.b32.xlu1 %v251_v28, %s948_s17 }
  0xfb   : > { %456 = vrot.lane.b32.xlu0 %v449_v30, %s948_s17  ;;  %454 = vrot.lane.b32.xlu1 %v448_v31, %s948_s17  ;;  %v491_v31 = vmul.f32 %v489_v53, %v1131_v58 }
  0xff   : > { %475 = vrot.lane.b32.xlu0 %v468_v33, %s949_s18  ;;  %458 = vrot.lane.b32.xlu1 %v450_v34, %s948_s17  ;;  %v409_v33 = vsel %vm408_vm6, %v1229_v25, %v1227_v22  ;;  %v492_v34 = vmul.f32 %v489_v53, %v1136_v60 }
 0x103   : > { %473 = vrot.lane.b32.xlu1 %v467_v35, %s949_s18  ;;  %259 = vrot.lane.b32.xlu0 %v252_v36, %s948_s17 }
 0x107   : > { %477 = vrot.lane.b32.xlu1 %v469_v38, %s949_s18  ;;  %281 = vrot.lane.b32.xlu0 %v273_v39, %s949_s18 }
 0x10b   : > { %261 = vrot.lane.b32.xlu1 %v253_v40, %s948_s17  ;;  %v550_v40 = vstv %s748_s10  ;;  %s655_s17 = sshll.u32 %s137_s16, 4  ;;  %s1319_s17 = int_to_ptr.vmem [resolvable:$true] %s655_s17 }
 0x10c   : > { %s873_s28 = scalar_lea.vmem %s1319_s17, 128  ;;  %p880_p7 = scmp.lt.s32.totalorder %s1319_s17, %s878_s6 }
 0x10d   : > { %p874_p9 = scmp.ne.s32.totalorder %s1319_s17, %s873_s28  ;;  %p881_p12 = scmp.lt.s32.totalorder %s879_s4, %s873_s28 }
 0x10f   : > { %279 = vrot.lane.b32.xlu1 %v272_v41, %s949_s18  ;;  %p875_p0 = pnand %p874_p9, %p1371_p13  ;;  %p882_p4 = por %p881_p12, %p880_p7 }
 0x111   : > { %p876_p1 = pneg %p875_p0 }
 0x113   : > { %p883_p6 = pnand %p882_p4, %p876_p1 }
 0x139   : > { %v501_v43 = vpop.permute.xlu1 %500  ;;  %v1204_v45 = vpop.permute.xlu0 %561 }
 0x13d   : > { %v522_v46 = vpop.permute.xlu1 %521  ;;  %v1206_v47 = vpop.permute.xlu0 %305 }
 0x141   : > { %v1208_v48 = vpop.permute.xlu1 %367  ;;  %v1210_v50 = vpop.permute.xlu0 %326 }
 0x145   : > { %v1212_v51 = vpop.permute.xlu1 %388  ;;  %v503_v52 = vpop.permute.xlu0 %502 }
 0x146   : > { %v506_v56 = vsel %vm263_vm4, %v501_v43, %v503_v52 }
 0x147   : > { %v511_v59 = vadd.f32 %v506_v56, %v490_v57 }
 0x149   : > { %v505_v54 = vpop.permute.xlu1 %504  ;;  %v1214_v55 = vpop.permute.xlu0 %565 }
 0x14a   : > { %v507_v29 = vsel %vm263_vm4, %v503_v52, %v505_v54  ;;  %v513_v43 = vadd.f32 %v505_v54, %v492_v34  ;;  %v297_v52 = vmul.f32 %v294_v7, %v1147_v4 }
 0x14b   : > { %v512_v35 = vadd.f32 %v507_v29, %v491_v31 }
 0x14d   : > { %v1218_v61 = vpop.permute.xlu1 %563  ;;  %v524_v62 = vpop.permute.xlu0 %523 }
 0x14e   : > { %v527_v63 = vsel %vm283_vm5, %v522_v46, %v524_v62  ;;  %v568_v41 = vsel %vm263_vm4, %v1218_v61, %v1214_v55  ;;  %v552_v46 = vmul.f32 %v550_v40, %v1131_v58 }
 0x14f   : > { %v532_v2 = vadd.f32 %v527_v63, %v511_v59 }
 0x150   : > { %v573_v53 = vadd.f32 %v568_v41, %v552_v46 }
 0x151   : > { %v308_v3 = vpop.permute.xlu1 %307  ;;  %538 = vrot.lane.b32.xlu1 %v532_v2, %s950_s9  ;;  %v310_v6 = vpop.permute.xlu0 %309 }
 0x152   : > { %v312_v11 = vsel %vm263_vm4, %v308_v3, %v310_v6  ;;  %v318_v57 = vadd.f32 %v310_v6, %v297_v52 }
 0x153   : > { %v317_v15 = vadd.f32 %v312_v11, %v296_v12  ;;  %v295_v11 = vmul.f32 %v294_v7, %v1120_v49  ;;  %v359_v12 = vmul.f32 %v356_v13, %v1147_v4  ;;  %v444_v7 = vstv %s1242_s11 }
 0x154   : > { %v357_v4 = vmul.f32 %v356_v13, %v1120_v49  ;;  %v446_v34 = vmul.f32 %v444_v7, %v1131_v58 }
 0x155   : > { %v372_v9 = vpop.permute.xlu1 %371  ;;  %v370_v10 = vpop.permute.xlu0 %369 }
 0x156   : > { %v374_v18 = vsel %vm263_vm4, %v370_v10, %v372_v9 }
 0x157   : > { %v379_v26 = vadd.f32 %v374_v18, %v358_v20  ;;  %v380_v20 = vadd.f32 %v372_v9, %v359_v12 }
 0x159   : > { %v329_v16 = vpop.permute.xlu1 %328  ;;  %v331_v17 = vpop.permute.xlu0 %330 }
 0x15a   : > { %v333_v19 = vsel %vm283_vm5, %v329_v16, %v331_v17  ;;  %v332_v6 = vsel %vm283_vm5, %v1210_v50, %v329_v16 }
 0x15b   : > { %v338_v21 = vadd.f32 %v333_v19, %v317_v15  ;;  %v339_v15 = vadd.f32 %v331_v17, %v318_v57 }
 0x15d   : > { %v393_v27 = vpop.permute.xlu1 %392  ;;  %345 = vrot.lane.b32.xlu1 %v338_v21, %s950_s9  ;;  %v391_v28 = vpop.permute.xlu0 %390 }
 0x15e   : > { %v395_v30 = vsel %vm283_vm5, %v391_v28, %v393_v27  ;;  %v401_v29 = vadd.f32 %v393_v27, %v380_v20  ;;  %v394_v50 = vsel %vm283_vm5, %v1212_v51, %v391_v28  ;;  %v551_v27 = vmul.f32 %v550_v40, %v1115_v44 }
 0x15f   : > { %v400_v32 = vadd.f32 %v395_v30, %v379_v26  ;;  %v445_v30 = vmul.f32 %v444_v7, %v1115_v44  ;;  %v233_v7 = vstv %s755_s14 }
 0x160   : > { %v415_v31 = vmul.f32 %v1227_v22, %v401_v29 }
 0x161   : > { %v526_v36 = vpop.permute.xlu1 %525  ;;  %v583_v38 = vpop.permute.xlu0 %582  ;;  %v414_v39 = vmul.f32 %v409_v33, %v400_v32 }
 0x162   : > { %v528_v42 = vsel %vm283_vm5, %v524_v62, %v526_v36  ;;  %v534_v59 = vadd.f32 %v526_v36, %v513_v43  ;;  %v311_v62 = vsel %vm263_vm4, %v1206_v47, %v308_v3  ;;  %v373_v3 = vsel %vm263_vm4, %v1208_v48, %v370_v10 }
 0x163   : > { %v533_v56 = vadd.f32 %v528_v42, %v512_v35  ;;  %421 = vrot.lane.b32.xlu1 %v414_v39, %s951_s12  ;;  %v316_v19 = vadd.f32 %v311_v62, %v295_v11  ;;  %v378_v9 = vadd.f32 %v373_v3, %v357_v4  ;;  %v567_v10 = vsel %vm263_vm4, %v1204_v45, %v1218_v61 }
 0x164   : > { %v247_v45 = vstv %s1260_s13  ;;  %v553_v61 = vmul.f32 %v550_v40, %v1136_v60  ;;  %v734_v4 = vsel %vm202_vm8, 1.0, %v946_v37 }
 0x165   : > { %v585_v63 = vpop.permute.xlu1 %584  ;;  %540 = vrot.lane.b32.xlu0 %v533_v56, %s950_s9  ;;  %v587_v2 = vpop.permute.xlu0 %586  ;;  %v337_v17 = vadd.f32 %v332_v6, %v316_v19  ;;  %v399_v32 = vadd.f32 %v394_v50, %v378_v9 }
 0x166   : > { %v589_v54 = vsel %vm283_vm5, %v585_v63, %v587_v2  ;;  %v588_v28 = vsel %vm283_vm5, %v583_v38, %v585_v63  ;;  %v574_v43 = vadd.f32 %v1214_v55, %v553_v61  ;;  %v248_v38 = vmul.f32 %v247_v45, %v1120_v49 }
 0x167   : > { %v594_v18 = vadd.f32 %v589_v54, %v573_v53  ;;  %542 = vrot.lane.b32.xlu1 %v534_v59, %s950_s9  ;;  %v413_v42 = vmul.f32 %v1229_v25, %v399_v32  ;;  %v249_v54 = vmul.f32 %v247_v45, %v1152_v8 }
 0x168   : > { %v595_v53 = vadd.f32 %v587_v2, %v574_v43 }
 0x169   : > { %v258_v21 = vpop.permute.xlu1 %257  ;;  %347 = vrot.lane.b32.xlu0 %v339_v15, %s950_s9  ;;  %v278_v26 = vpop.permute.xlu0 %277  ;;  %v597_v47 = vmul.f32 %v594_v18, %v409_v33  ;;  %v572_v33 = vadd.f32 %v567_v10, %v551_v27 }
 0x16a   : > { %v598_v63 = vmul.f32 %v1227_v22, %v595_v53 }
 0x16b   : > { %604 = vrot.lane.b32.xlu1 %v597_v47, %s951_s12  ;;  %v593_v41 = vadd.f32 %v588_v28, %v572_v33 }
 0x16d   : > { %v455_v16 = vpop.permute.xlu1 %454  ;;  %343 = vrot.lane.b32.xlu0 %v337_v17, %s950_s9  ;;  %v457_v48 = vpop.permute.xlu0 %456  ;;  %v596_v60 = vmul.f32 %v1229_v25, %v593_v41 }
 0x16e   : > { %v460_v13 = vsel %vm263_vm4, %v455_v16, %v457_v48 }
 0x16f   : > { %v464_v51 = vadd.f32 %v460_v13, %v445_v30 }
 0x171   : > { %v459_v35 = vpop.permute.xlu1 %458  ;;  %v476_v36 = vpop.permute.xlu0 %475  ;;  %423 = vrot.lane.b32.xlu0 %v415_v31, %s951_s12 }
 0x172   : > { %v461_v39 = vsel %vm263_vm4, %v457_v48, %v459_v35 }
 0x173   : > { %v465_v44 = vadd.f32 %v461_v39, %v446_v34 }
 0x175   : > { %v474_v46 = vpop.permute.xlu1 %473  ;;  %v260_v52 = vpop.permute.xlu0 %259  ;;  %419 = vrot.lane.b32.xlu0 %v413_v42, %s951_s12 }
 0x176   : > { %v479_v58 = vsel %vm283_vm5, %v474_v46, %v476_v36  ;;  %v264_v56 = vsel %vm263_vm4, %v258_v21, %v260_v52  ;;  %v735_v21 = vsel %vm203_vm7, 1.0, %v946_v37 }
 0x177   : > { %v483_v57 = vadd.f32 %v479_v58, %v464_v51  ;;  %v268_v59 = vadd.f32 %v264_v56, %v248_v38 }
 0x179   : > { %v478_v40 = vpop.permute.xlu1 %477  ;;  %602 = vrot.lane.b32.xlu0 %v596_v60, %s951_s12  ;;  %v282_v12 = vpop.permute.xlu0 %281  ;;  %v485_v32 = vmul.f32 %v734_v4, %v483_v57  ;;  %v627_v57 = vshrl.u32 %v175_v0, 7 }
 0x17a   : > { %v480_v55 = vsel %vm283_vm5, %v476_v36, %v478_v40 }
 0x17b   : > { %v484_v49 = vadd.f32 %v480_v55, %v465_v44 }
 0x17d   : > { %v262_v62 = vpop.permute.xlu1 %261  ;;  %606 = vrot.lane.b32.xlu0 %v598_v63, %s951_s12  ;;  %v486_v23 = vmul.f32 %v735_v21, %v484_v49 }
 0x17e   : > { %v265_v11 = vsel %vm263_vm4, %v260_v52, %v262_v62 }
 0x17f   : > { %v269_v2 = vadd.f32 %v265_v11, %v249_v54 }
 0x181   : > { %v280_v15 = vpop.permute.xlu1 %279 }
 0x182   : > { %v284_v25 = vsel %vm283_vm5, %v278_v26, %v280_v15  ;;  %v285_v18 = vsel %vm283_vm5, %v280_v15, %v282_v12 }
 0x183   : > { %v288_v6 = vadd.f32 %v284_v25, %v268_v59  ;;  %v289_v19 = vadd.f32 %v285_v18, %v269_v2  ;;  %v628_v59 = vsub.s32 0, %v627_v57 }
 0x185   : > { %v291_v47 = vmul.f32 %v735_v21, %v289_v19  ;;  %v290_v29 = vmul.f32 %v734_v4, %v288_v6 }
 0x187   : > { %v293_v14 = vadd.f32 %v291_v47, %v233_v7  ;;  %v292_v30 = vadd.f32 %v290_v29, %v233_v7 }
 0x1c3   : > { %v539_v22 = vpop.permute.xlu1 %538 }
 0x1cf   : > { %v346_v3 = vpop.permute.xlu1 %345 }
 0x1d5   : > { %v422_v50 = vpop.permute.xlu1 %421 }
 0x1d7   : > { %v541_v20 = vpop.permute.xlu0 %540 }
 0x1d8   : > { %v544_v34 = vsel %vm349_vm9, %v539_v22, %v541_v20 }
 0x1d9   : > { %v543_v10 = vpop.permute.xlu1 %542 }
 0x1da   : > { %v545_v39 = vsel %vm349_vm9, %v541_v20, %v543_v10 }
 0x1db   : > { %v348_v8 = vpop.permute.xlu0 %347 }
 0x1dc   : > { %v351_v17 = vsel %vm349_vm9, %v346_v3, %v348_v8 }
 0x1dd   : > { %v355_v24 = vadd.f32 %v351_v17, %v293_v14  ;;  %v605_v35 = vpop.permute.xlu1 %604 }
 0x1df   : > { %v344_v26 = vpop.permute.xlu0 %343 }
 0x1e0   : > { %v350_v16 = vsel %vm349_vm9, %v344_v26, %v346_v3 }
 0x1e1   : > { %v354_v13 = vadd.f32 %v350_v16, %v292_v30 }
 0x1e3   : > { %v424_v9 = vpop.permute.xlu0 %423 }
 0x1e4   : > { %v427_v5 = vsel %vm425_vm10, %v422_v50, %v424_v9 }
 0x1e5   : > { %v431_v48 = vadd.f32 %v427_v5, %v355_v24 }
 0x1e7   : > { %v488_v27 = vadd.f32 %v486_v23, %v431_v48  ;;  %v420_v31 = vpop.permute.xlu0 %419 }
 0x1e8   : > { %v426_v37 = vsel %vm425_vm10, %v420_v31, %v422_v50 }
 0x1e9   : > { %v430_v51 = vadd.f32 %v426_v37, %v354_v13  ;;  %v549_v44 = vadd.f32 %v545_v39, %v488_v27 }
 0x1eb   : > { %v487_v28 = vadd.f32 %v485_v32, %v430_v51  ;;  %v603_v33 = vpop.permute.xlu0 %602 }
 0x1ec   : > { %v608_v45 = vsel %vm425_vm10, %v603_v33, %v605_v35 }
 0x1ed   : > { %v548_v36 = vadd.f32 %v544_v34, %v487_v28 }
 0x1ef   : > { %v612_v61 = vadd.f32 %v608_v45, %v548_v36  ;;  %v607_v41 = vpop.permute.xlu0 %606 }
 0x1f0   : > { %v609_v42 = vsel %vm425_vm10, %v605_v35, %v607_v41 }
 0x1f1   : > { %v756_v43 = vmul.f32 -1.442695, %v612_v61  ;;  %v613_v46 = vadd.f32 %v609_v42, %v549_v44 }
 0x1f3   : > { %825 = vpow2.f32 %v756_v43  ;;  %v757_v38 = vmul.f32 -1.442695, %v613_v46 }
 0x1f5   : > { %827 = vpow2.f32 %v757_v38 }
 0x1fd   : > { %v826_v52 = vpop.eup %825 }
 0x1fe   : > { %v620_v58 = vadd.f32 1.0, %v826_v52 }
 0x1ff   : > { %v828_v56 = vpop.eup %827 }
 0x200   : > { %829 = vrcp.f32 %v620_v58  ;;  %v621_v53 = vadd.f32 1.0, %v828_v56 }
 0x202   : > { %831 = vrcp.f32 %v621_v53 }
 0x20a   : > { %v830_v60 = vpop.eup %829 }
 0x20b   : > { %v629_v40 = vrot.slane %v830_v60, %v628_v59 }
 0x20c   : > { %v832_v55 = vpop.eup %831 }
 0x20d   : > { %v633_v63 = vrot.slane %v832_v55, %v628_v59 }
 0x20f   : > { %v636_v49 = vcombine.low %v629_v40, %v633_v63 }
 0x211   : > { %v638_v62 = vmul.f32 %v636_v49, %v1094_v1 }
 0x213   : > { %639 = vst [vmem:[%s137_s16] sm:$0xff] %v638_v62 }
 0x214   : > { %886 = shalt.err (!%p883_p6)
}
 0x215   : > { %s887_s5 = scalar_lea.hbm %s1317_s25, 128  ;;  %s891_s29 = scalar_lea.hbm %s1362_s2, 512 }
 0x216   : > { %p888_p8 = scmp.ne.s32.totalorder %s1317_s25, %s887_s5  ;;  %p892_p2 = scmp.lt.u32.totalorder %s1317_s25, %s1362_s2 }
 0x217   : > { %p893_p3 = scmp.lt.u32.totalorder %s891_s29, %s887_s5  ;;  %p895_p9 = scmp.lt.u32.totalorder %s887_s5, %s1317_s25 }
 0x218   : > { %p889_p10 = pnand %p888_p8, %p1371_p13 }
 0x219   : > { %p894_p5 = por %p893_p3, %p892_p2 }
 0x21a   : > { %p890_p11 = pneg %p889_p10 }
 0x21b   : > { %p896_p0 = por %p895_p9, %p894_p5 }
 0x21d   : > { %p897_p1 = pnand %p896_p0, %p890_p11 }
 0x21f   : > { %900 = shalt.err (!%p897_p1)
}
 0x220   : > { %767 = dma.vmem_to_hbm [thread:$0]  (%p1371_p13), %s1319_s17, 128, %s1317_s25, %s641_s26  }
 0x221 PF: > { %p778_p7 = scmp.ge.s32.totalorder %s941_s22, 2  ;;  %s667_s11 = sand.u32 1, %s929_s19  }
 0x222   : > { %p1372_p12 = scmp.ne.s32.totalorder %s1367_s3, 0  ;;  %s668_s12 = scalar_lea.sflag [#allocation6], %s667_s11 }
 0x224   : > { %p774_p4 = pnand %p778_p7, %p1372_p12 }
 0x226   : > { %924 = dma.done.wait (!%p774_p4), %s668_s12, 128  }
 0x227   : > { %926 = vsyncadd (!%p774_p4), %s668_s12, 4294967168  ;;  %p19_p6 = scmp.ge.s32.totalorder %s1005_s24, 6   ;;  %s1373_s19 = smov %s933_s20 }
 0x228   : > { %s1374_s20 = smov %s937_s21  ;;  %s1375_s21 = smov %s1017_s27 }
 0x229   : > { %s1376_s22 = smov %s1005_s24  ;;  %21 = sbr.rel (!%p19_p6) target bundleno = 17 (0x11), region = 69 }
 0x230   :  { %673 = vsyncpa [#allocation5], 1 }
 0x231   :  { %675 = vsyncpa [#allocation5 + $0x1], 1 }
 0x232   :  { %676 = vsyncpa [#allocation6], 1 }
 0x233   :  { %678 = vsyncpa [#allocation6 + $0x1], 1 }

</bundles_post_ra>
